<compile_context>
chip_gen: v6e
topology: v6e:2x2x1
jax: 0.10.0
libtpu: 0.0.40
codegen_flags: <defaults>
</compile_context>

<pallas_src>
import math

import jax
import jax.numpy as jnp
from jax import lax
from jax.experimental import pallas as pl
from jax.experimental.pallas import tpu as pltpu


def _make_conv_proj_kernel(k, s, tr, w_out, c):
    """Build the fused depthwise-conv + (folded BN) + pointwise-conv kernel body."""

    def kernel(x_ref, wdw_ref, wpc_ref, bpc_ref, o_ref):
        # x_ref:   (1, s*s, Hph, Wph, C)  phase-split, zero-padded image of batch b
        # wdw_ref: (k*k, C)               depthwise taps (per-channel)
        # wpc_ref: (C, C)                 pointwise weight, (in, out) layout, BN scale folded
        # bpc_ref: (1, C)                 folded bias (dw_bias/BN shift/pointwise bias)
        # o_ref:   (1, tr*w_out, C)       output row-tile (lane-dense)
        t = pl.program_id(1)
        row0 = pl.multiple_of(t * tr, tr)

        # Depthwise conv: k*k shifted unit-stride slices, accumulated in f32 on the VPU.
        acc = jnp.zeros((tr, w_out, c), jnp.float32)
        for kh in range(k):
            for kw in range(k):
                phase = (kh % s) * s + (kw % s)          # static phase index
                ch, cw = kh // s, kw // s                # static coarse offsets
                xs = x_ref[0, phase, pl.ds(row0 + ch, tr), pl.ds(cw, w_out), :]
                tap = wdw_ref[kh * k + kw, :]
                acc = acc + xs.astype(jnp.float32) * tap.astype(jnp.float32)

        # Pointwise 1x1 conv (BN scale already folded into the weight) == MXU matmul.
        h = acc.reshape(tr * w_out, c)
        y = jnp.dot(h.astype(wpc_ref.dtype), wpc_ref[...],
                    preferred_element_type=jnp.float32)
        y = y + bpc_ref[...].astype(jnp.float32)
        o_ref[0, :, :] = y.astype(o_ref.dtype)

    return kernel


def _pick_row_tile(h_out, w_out, c, itemsize, row_tile):
    """Largest legal row tile under a modest VMEM budget (acc + double-buffered out)."""
    if row_tile is not None:
        tr = max(1, min(int(row_tile), h_out))
        while h_out % tr:
            tr -= 1
    else:
        budget = 6 * 1024 * 1024
        tr = 1
        for cand in range(h_out, 0, -1):
            if h_out % cand:
                continue
            acc_bytes = cand * w_out * c * 4             # f32 register accumulator
            out_bytes = 2 * cand * w_out * c * itemsize  # double-buffered out block
            if acc_bytes + out_bytes <= budget:
                tr = cand
                break
    # Output block's second-to-last dim must be a multiple of 8 unless full-extent.
    if tr != h_out and (tr * w_out) % 8 != 0:
        tr = h_out   # full-extent block is always a legal block shape
    return tr


def conv_projection_forward(x, dw_weight, dw_bias, bn_gamma, bn_beta, bn_mean,
                            bn_var, pc_weight, pc_bias, *, kernel_size, stride,
                            bn_eps=1e-5, row_tile=None):
    """ConvProjection forward.

    Args (PyTorch layouts):
      x:         (B, C, H, W)
      dw_weight: (C, 1, k, k)   depthwise conv weight (groups=C)
      dw_bias:   (C,)
      bn_*:      (C,)           BatchNorm2d affine params / running stats
      pc_weight: (C, C, 1, 1)   pointwise conv weight
      pc_bias:   (C,)
    Returns:
      (B, H_out*W_out, C)       == conv_out.flatten(2).permute(0, 2, 1)
    """
    B, C, H, W = x.shape
    k, s = kernel_size, stride
    p = (k - 1) // 2
    h_out = (H + 2 * p - k) // s + 1
    w_out = (W + 2 * p - k) // s + 1

    # ---- layout plumbing (wrapper-side, outside the kernel) ------------------
    # NCHW -> NHWC so channels land on the 128-lane axis.
    x_nhwc = jnp.transpose(x, (0, 2, 3, 1))

    # Pad (and crop) so the phase-split view covers every tap without in-kernel
    # bounds checks.
    hph = h_out + (k - 1) // s        # coarse rows needed per phase
    wph = w_out + (k - 1) // s
    hp_t, wp_t = s * hph, s * wph
    pad_b = max(hp_t - H - p, 0)
    pad_r = max(wp_t - W - p, 0)
    x_pad = jnp.pad(x_nhwc, ((0, 0), (p, pad_b), (p, pad_r), (0, 0)))
    x_pad = x_pad[:, :hp_t, :wp_t, :]

    # Phase split (space-to-depth): x_ph[b, ph*s+pw, i, j, c] = x_pad[b, i*s+ph, j*s+pw, c]
    x_ph = x_pad.reshape(B, hph, s, wph, s, C)
    x_ph = jnp.transpose(x_ph, (0, 2, 4, 1, 3, 5)).reshape(B, s * s, hph, wph, C)

    # Parameter repacks + folding.  Inference-mode BN:
    #   h = (acc + dw_bias - mean) * scale + beta      (scale = gamma / sqrt(var+eps))
    #   y = h @ Wpc + bpc
    # Fold scale into Wpc and everything affine into one epilogue bias:
    #   y = acc @ (scale[:,None] * Wpc) + (shift @ Wpc + bpc),  shift = (dw_bias-mean)*scale+beta
    f32 = jnp.float32
    wdw = jnp.transpose(dw_weight.reshape(C, k * k), (1, 0))                 # (k*k, C)
    scale = (bn_gamma.astype(f32) / jnp.sqrt(bn_var.astype(f32) + bn_eps))   # (C,)
    shift = (dw_bias.astype(f32) - bn_mean.astype(f32)) * scale + bn_beta.astype(f32)
    wpc_io = jnp.transpose(pc_weight[:, :, 0, 0], (1, 0)).astype(f32)        # (C_in, C_out)
    wpc = (scale[:, None] * wpc_io).astype(pc_weight.dtype)                  # scale folded
    bpc = (shift @ wpc_io + pc_bias.astype(f32)).reshape(1, C)               # folded bias

    # ---- tiling ---------------------------------------------------------------
    bpe = jnp.dtype(x.dtype).itemsize
    tr = _pick_row_tile(h_out, w_out, C, bpe, row_tile)
    grid = (B, h_out // tr)
    m = h_out * w_out
    kernel = _make_conv_proj_kernel(k, s, tr, w_out, C)

    flops = 2 * B * m * C * (k * k) + 2 * B * m * C * C
    bytes_accessed = bpe * (x_ph.size + wdw.size + C * C + B * m * C) + 4 * C

    out = pl.pallas_call(
        kernel,
        out_shape=jax.ShapeDtypeStruct((B, m, C), x.dtype),
        grid=grid,
        in_specs=[
            # Full phase-split image of batch b; constant over the row-tile axis so
            # it stays VMEM-resident while output tiles are streamed out.
            pl.BlockSpec((1, s * s, hph, wph, C), lambda b, t: (b, 0, 0, 0, 0)),
            # Weights / folded params: constant index maps -> fetched once, resident.
            pl.BlockSpec((k * k, C), lambda b, t: (0, 0)),
            pl.BlockSpec((C, C), lambda b, t: (0, 0)),
            pl.BlockSpec((1, C), lambda b, t: (0, 0)),
        ],
        out_specs=pl.BlockSpec((1, tr * w_out, C), lambda b, t: (b, t, 0)),
        compiler_params=pltpu.CompilerParams(
            dimension_semantics=("parallel", "parallel")),
        cost_estimate=pl.CostEstimate(
            flops=int(flops), transcendentals=0, bytes_accessed=int(bytes_accessed)),
    )(x_ph, wdw, wpc, bpc)

    return out


def init_conv_projection_params(key, channels, kernel_size, dtype=jnp.float32):
    """PyTorch-default-style init, plus non-trivial BN stats so the test is meaningful."""
    k1, k2, k3, k4, k5, k6, k7, k8 = jax.random.split(key, 8)
    k = kernel_size
    bdw = 1.0 / math.sqrt(1 * k * k)          # fan_in = in_ch/groups * k*k = k*k
    bpc = 1.0 / math.sqrt(channels)           # fan_in = channels * 1 * 1
    return dict(
        dw_weight=jax.random.uniform(k1, (channels, 1, k, k), dtype, -bdw, bdw),
        dw_bias=jax.random.uniform(k2, (channels,), dtype, -bdw, bdw),
        pc_weight=jax.random.uniform(k3, (channels, channels, 1, 1), dtype, -bpc, bpc),
        pc_bias=jax.random.uniform(k4, (channels,), dtype, -bpc, bpc),
        bn_gamma=1.0 + 0.1 * jax.random.normal(k5, (channels,), dtype),
        bn_beta=0.1 * jax.random.normal(k6, (channels,), dtype),
        bn_mean=0.1 * jax.random.normal(k7, (channels,), dtype),
        bn_var=jax.random.uniform(k8, (channels,), dtype, 0.5, 1.5),
    )


def conv_projection_reference(x, prm, *, kernel_size, stride, bn_eps=1e-5):
    """Pure-JAX/XLA reference of the same math (inference-mode BN)."""
    k, s = kernel_size, stride
    p = (k - 1) // 2
    B, C, _, _ = x.shape
    dn = ("NCHW", "OIHW", "NCHW")
    dw = lax.conv_general_dilated(
        x, prm["dw_weight"], (s, s), [(p, p), (p, p)],
        feature_group_count=C, dimension_numbers=dn,
        precision=lax.Precision.HIGHEST)
    dw = dw + prm["dw_bias"][None, :, None, None]
    scale = prm["bn_gamma"] / jnp.sqrt(prm["bn_var"] + bn_eps)
    bn = (dw - prm["bn_mean"][None, :, None, None]) * scale[None, :, None, None] \
         + prm["bn_beta"][None, :, None, None]
    pc = lax.conv_general_dilated(
        bn, prm["pc_weight"], (1, 1), [(0, 0), (0, 0)],
        dimension_numbers=dn, precision=lax.Precision.HIGHEST)
    pc = pc + prm["pc_bias"][None, :, None, None]
    return pc.reshape(B, C, -1).transpose(0, 2, 1)


if __name__ == "__main__":
    key = jax.random.PRNGKey(0)
    kx, kp = jax.random.split(key)

    batch, channels, height, width = 2, 128, 16, 16
    kernel_size, stride = 3, 2

    x = jax.random.normal(kx, (batch, channels, height, width), dtype=jnp.float32)
    prm = init_conv_projection_params(kp, channels, kernel_size)

    # Strided (k/v projection) configuration.
    out = conv_projection_forward(
        x, prm["dw_weight"], prm["dw_bias"], prm["bn_gamma"], prm["bn_beta"],
        prm["bn_mean"], prm["bn_var"], prm["pc_weight"], prm["pc_bias"],
        kernel_size=kernel_size, stride=stride)
    out = jax.block_until_ready(out)
    ref = conv_projection_reference(x, prm, kernel_size=kernel_size, stride=stride)
    p = (kernel_size - 1) // 2
    h_out = (height + 2 * p - kernel_size) // stride + 1
    assert out.shape == (batch, h_out * h_out, channels)
    assert jnp.allclose(out, ref, atol=1e-3, rtol=1e-3), \
        f"max abs err {jnp.max(jnp.abs(out - ref))}"

    # Also exercise the stride=1 (q projection) configuration.
    out1 = conv_projection_forward(
        x, prm["dw_weight"], prm["dw_bias"], prm["bn_gamma"], prm["bn_beta"],
        prm["bn_mean"], prm["bn_var"], prm["pc_weight"], prm["pc_bias"],
        kernel_size=kernel_size, stride=1)
    out1 = jax.block_until_ready(out1)
    ref1 = conv_projection_reference(x, prm, kernel_size=kernel_size, stride=1)
    assert out1.shape == (batch, height * width, channels)
    assert jnp.allclose(out1, ref1, atol=1e-3, rtol=1e-3), \
        f"max abs err {jnp.max(jnp.abs(out1 - ref1))}"

    print("KERNEL_OK")
</pallas_src>

<mosaic_0001>
module attributes {stable_mosaic.version = 11 : i64} {
  func.func @kernel(%arg0: i32, %arg1: i32, %arg2: memref<1x4x9x9x128xf32, #tpu.memory_space<vmem>>, %arg3: memref<9x128xf32, #tpu.memory_space<vmem>>, %arg4: memref<128x128xf32, #tpu.memory_space<vmem>>, %arg5: memref<1x128xf32, #tpu.memory_space<vmem>>, %arg6: memref<1x64x128xf32, #tpu.memory_space<vmem>>) attributes {dimension_semantics = [#tpu.dimension_semantics<parallel>, #tpu.dimension_semantics<parallel>], iteration_bounds = array<i64: 2, 1>, scalar_prefetch = 0 : i64, scratch_operands = 0 : i64, tpu.core_type = #tpu.core_type<tc>, window_params = [{transform_indices = @transform_0, window_bounds = array<i64: 1, 4, 9, 9, 128>}, {pipeline_mode = #tpu.pipeline_mode<synchronous>, transform_indices = @transform_1, window_bounds = array<i64: 9, 128>}, {pipeline_mode = #tpu.pipeline_mode<synchronous>, transform_indices = @transform_2, window_bounds = array<i64: 128, 128>}, {pipeline_mode = #tpu.pipeline_mode<synchronous>, transform_indices = @transform_3, window_bounds = array<i64: 1, 128>}, {transform_indices = @transform_4, window_bounds = array<i64: 1, 64, 128>}]} {
    %c8_i32 = arith.constant 8 : i32
    %0 = arith.muli %arg1, %c8_i32 : i32
    %1 = tpu.assume_multiple %0, 8 : i32
    %cst = arith.constant 0.000000e+00 : f32
    %2 = vector.broadcast %cst : f32 to vector<8x8x128xf32>
    %c0_i32 = arith.constant 0 : i32
    %3 = arith.addi %1, %c0_i32 : i32
    %c0 = arith.constant 0 : index
    %c0_0 = arith.constant 0 : index
    %4 = arith.index_cast %3 : i32 to index
    %c0_1 = arith.constant 0 : index
    %c0_2 = arith.constant 0 : index
    %5 = vector.load %arg2[%c0, %c0_0, %4, %c0_1, %c0_2] : memref<1x4x9x9x128xf32, #tpu.memory_space<vmem>>, vector<1x1x8x8x128xf32>
    %6 = vector.shape_cast %5 : vector<1x1x8x8x128xf32> to vector<8x8x128xf32>
    %c0_3 = arith.constant 0 : index
    %c0_4 = arith.constant 0 : index
    %7 = vector.load %arg3[%c0_3, %c0_4] : memref<9x128xf32, #tpu.memory_space<vmem>>, vector<1x128xf32>
    %8 = vector.shape_cast %7 : vector<1x128xf32> to vector<128xf32>
    %9 = vector.shape_cast %8 : vector<128xf32> to vector<1x1x128xf32>
    %10 = vector.broadcast %9 : vector<1x1x128xf32> to vector<8x8x128xf32>
    %11 = arith.mulf %6, %10 : vector<8x8x128xf32>
    %12 = arith.addf %2, %11 : vector<8x8x128xf32>
    %c0_i32_5 = arith.constant 0 : i32
    %13 = arith.addi %1, %c0_i32_5 : i32
    %c0_6 = arith.constant 0 : index
    %c1 = arith.constant 1 : index
    %14 = arith.index_cast %13 : i32 to index
    %c0_7 = arith.constant 0 : index
    %c0_8 = arith.constant 0 : index
    %15 = vector.load %arg2[%c0_6, %c1, %14, %c0_7, %c0_8] : memref<1x4x9x9x128xf32, #tpu.memory_space<vmem>>, vector<1x1x8x8x128xf32>
    %16 = vector.shape_cast %15 : vector<1x1x8x8x128xf32> to vector<8x8x128xf32>
    %c1_9 = arith.constant 1 : index
    %c0_10 = arith.constant 0 : index
    %17 = vector.load %arg3[%c1_9, %c0_10] : memref<9x128xf32, #tpu.memory_space<vmem>>, vector<1x128xf32>
    %18 = vector.shape_cast %17 : vector<1x128xf32> to vector<128xf32>
    %19 = vector.shape_cast %18 : vector<128xf32> to vector<1x1x128xf32>
    %20 = vector.broadcast %19 : vector<1x1x128xf32> to vector<8x8x128xf32>
    %21 = arith.mulf %16, %20 : vector<8x8x128xf32>
    %22 = arith.addf %12, %21 : vector<8x8x128xf32>
    %c0_i32_11 = arith.constant 0 : i32
    %23 = arith.addi %1, %c0_i32_11 : i32
    %c0_12 = arith.constant 0 : index
    %c0_13 = arith.constant 0 : index
    %24 = arith.index_cast %23 : i32 to index
    %c1_14 = arith.constant 1 : index
    %c0_15 = arith.constant 0 : index
    %25 = vector.load %arg2[%c0_12, %c0_13, %24, %c1_14, %c0_15] : memref<1x4x9x9x128xf32, #tpu.memory_space<vmem>>, vector<1x1x8x8x128xf32>
    %26 = vector.shape_cast %25 : vector<1x1x8x8x128xf32> to vector<8x8x128xf32>
    %c2 = arith.constant 2 : index
    %c0_16 = arith.constant 0 : index
    %27 = vector.load %arg3[%c2, %c0_16] : memref<9x128xf32, #tpu.memory_space<vmem>>, vector<1x128xf32>
    %28 = vector.shape_cast %27 : vector<1x128xf32> to vector<128xf32>
    %29 = vector.shape_cast %28 : vector<128xf32> to vector<1x1x128xf32>
    %30 = vector.broadcast %29 : vector<1x1x128xf32> to vector<8x8x128xf32>
    %31 = arith.mulf %26, %30 : vector<8x8x128xf32>
    %32 = arith.addf %22, %31 : vector<8x8x128xf32>
    %c0_i32_17 = arith.constant 0 : i32
    %33 = arith.addi %1, %c0_i32_17 : i32
    %c0_18 = arith.constant 0 : index
    %c2_19 = arith.constant 2 : index
    %34 = arith.index_cast %33 : i32 to index
    %c0_20 = arith.constant 0 : index
    %c0_21 = arith.constant 0 : index
    %35 = vector.load %arg2[%c0_18, %c2_19, %34, %c0_20, %c0_21] : memref<1x4x9x9x128xf32, #tpu.memory_space<vmem>>, vector<1x1x8x8x128xf32>
    %36 = vector.shape_cast %35 : vector<1x1x8x8x128xf32> to vector<8x8x128xf32>
    %c3 = arith.constant 3 : index
    %c0_22 = arith.constant 0 : index
    %37 = vector.load %arg3[%c3, %c0_22] : memref<9x128xf32, #tpu.memory_space<vmem>>, vector<1x128xf32>
    %38 = vector.shape_cast %37 : vector<1x128xf32> to vector<128xf32>
    %39 = vector.shape_cast %38 : vector<128xf32> to vector<1x1x128xf32>
    %40 = vector.broadcast %39 : vector<1x1x128xf32> to vector<8x8x128xf32>
    %41 = arith.mulf %36, %40 : vector<8x8x128xf32>
    %42 = arith.addf %32, %41 : vector<8x8x128xf32>
    %c0_i32_23 = arith.constant 0 : i32
    %43 = arith.addi %1, %c0_i32_23 : i32
    %c0_24 = arith.constant 0 : index
    %c3_25 = arith.constant 3 : index
    %44 = arith.index_cast %43 : i32 to index
    %c0_26 = arith.constant 0 : index
    %c0_27 = arith.constant 0 : index
    %45 = vector.load %arg2[%c0_24, %c3_25, %44, %c0_26, %c0_27] : memref<1x4x9x9x128xf32, #tpu.memory_space<vmem>>, vector<1x1x8x8x128xf32>
    %46 = vector.shape_cast %45 : vector<1x1x8x8x128xf32> to vector<8x8x128xf32>
    %c4 = arith.constant 4 : index
    %c0_28 = arith.constant 0 : index
    %47 = vector.load %arg3[%c4, %c0_28] : memref<9x128xf32, #tpu.memory_space<vmem>>, vector<1x128xf32>
    %48 = vector.shape_cast %47 : vector<1x128xf32> to vector<128xf32>
    %49 = vector.shape_cast %48 : vector<128xf32> to vector<1x1x128xf32>
    %50 = vector.broadcast %49 : vector<1x1x128xf32> to vector<8x8x128xf32>
    %51 = arith.mulf %46, %50 : vector<8x8x128xf32>
    %52 = arith.addf %42, %51 : vector<8x8x128xf32>
    %c0_i32_29 = arith.constant 0 : i32
    %53 = arith.addi %1, %c0_i32_29 : i32
    %c0_30 = arith.constant 0 : index
    %c2_31 = arith.constant 2 : index
    %54 = arith.index_cast %53 : i32 to index
    %c1_32 = arith.constant 1 : index
    %c0_33 = arith.constant 0 : index
    %55 = vector.load %arg2[%c0_30, %c2_31, %54, %c1_32, %c0_33] : memref<1x4x9x9x128xf32, #tpu.memory_space<vmem>>, vector<1x1x8x8x128xf32>
    %56 = vector.shape_cast %55 : vector<1x1x8x8x128xf32> to vector<8x8x128xf32>
    %c5 = arith.constant 5 : index
    %c0_34 = arith.constant 0 : index
    %57 = vector.load %arg3[%c5, %c0_34] : memref<9x128xf32, #tpu.memory_space<vmem>>, vector<1x128xf32>
    %58 = vector.shape_cast %57 : vector<1x128xf32> to vector<128xf32>
    %59 = vector.shape_cast %58 : vector<128xf32> to vector<1x1x128xf32>
    %60 = vector.broadcast %59 : vector<1x1x128xf32> to vector<8x8x128xf32>
    %61 = arith.mulf %56, %60 : vector<8x8x128xf32>
    %62 = arith.addf %52, %61 : vector<8x8x128xf32>
    %c1_i32 = arith.constant 1 : i32
    %63 = arith.addi %1, %c1_i32 : i32
    %c0_35 = arith.constant 0 : index
    %c0_36 = arith.constant 0 : index
    %64 = arith.index_cast %63 : i32 to index
    %c0_37 = arith.constant 0 : index
    %c0_38 = arith.constant 0 : index
    %65 = vector.load %arg2[%c0_35, %c0_36, %64, %c0_37, %c0_38] : memref<1x4x9x9x128xf32, #tpu.memory_space<vmem>>, vector<1x1x8x8x128xf32>
    %66 = vector.shape_cast %65 : vector<1x1x8x8x128xf32> to vector<8x8x128xf32>
    %c6 = arith.constant 6 : index
    %c0_39 = arith.constant 0 : index
    %67 = vector.load %arg3[%c6, %c0_39] : memref<9x128xf32, #tpu.memory_space<vmem>>, vector<1x128xf32>
    %68 = vector.shape_cast %67 : vector<1x128xf32> to vector<128xf32>
    %69 = vector.shape_cast %68 : vector<128xf32> to vector<1x1x128xf32>
    %70 = vector.broadcast %69 : vector<1x1x128xf32> to vector<8x8x128xf32>
    %71 = arith.mulf %66, %70 : vector<8x8x128xf32>
    %72 = arith.addf %62, %71 : vector<8x8x128xf32>
    %c1_i32_40 = arith.constant 1 : i32
    %73 = arith.addi %1, %c1_i32_40 : i32
    %c0_41 = arith.constant 0 : index
    %c1_42 = arith.constant 1 : index
    %74 = arith.index_cast %73 : i32 to index
    %c0_43 = arith.constant 0 : index
    %c0_44 = arith.constant 0 : index
    %75 = vector.load %arg2[%c0_41, %c1_42, %74, %c0_43, %c0_44] : memref<1x4x9x9x128xf32, #tpu.memory_space<vmem>>, vector<1x1x8x8x128xf32>
    %76 = vector.shape_cast %75 : vector<1x1x8x8x128xf32> to vector<8x8x128xf32>
    %c7 = arith.constant 7 : index
    %c0_45 = arith.constant 0 : index
    %77 = vector.load %arg3[%c7, %c0_45] : memref<9x128xf32, #tpu.memory_space<vmem>>, vector<1x128xf32>
    %78 = vector.shape_cast %77 : vector<1x128xf32> to vector<128xf32>
    %79 = vector.shape_cast %78 : vector<128xf32> to vector<1x1x128xf32>
    %80 = vector.broadcast %79 : vector<1x1x128xf32> to vector<8x8x128xf32>
    %81 = arith.mulf %76, %80 : vector<8x8x128xf32>
    %82 = arith.addf %72, %81 : vector<8x8x128xf32>
    %c1_i32_46 = arith.constant 1 : i32
    %83 = arith.addi %1, %c1_i32_46 : i32
    %c0_47 = arith.constant 0 : index
    %c0_48 = arith.constant 0 : index
    %84 = arith.index_cast %83 : i32 to index
    %c1_49 = arith.constant 1 : index
    %c0_50 = arith.constant 0 : index
    %85 = vector.load %arg2[%c0_47, %c0_48, %84, %c1_49, %c0_50] : memref<1x4x9x9x128xf32, #tpu.memory_space<vmem>>, vector<1x1x8x8x128xf32>
    %86 = vector.shape_cast %85 : vector<1x1x8x8x128xf32> to vector<8x8x128xf32>
    %c8 = arith.constant 8 : index
    %c0_51 = arith.constant 0 : index
    %87 = vector.load %arg3[%c8, %c0_51] : memref<9x128xf32, #tpu.memory_space<vmem>>, vector<1x128xf32>
    %88 = vector.shape_cast %87 : vector<1x128xf32> to vector<128xf32>
    %89 = vector.shape_cast %88 : vector<128xf32> to vector<1x1x128xf32>
    %90 = vector.broadcast %89 : vector<1x1x128xf32> to vector<8x8x128xf32>
    %91 = arith.mulf %86, %90 : vector<8x8x128xf32>
    %92 = arith.addf %82, %91 : vector<8x8x128xf32>
    %93 = vector.shape_cast %92 : vector<8x8x128xf32> to vector<64x128xf32>
    %c0_52 = arith.constant 0 : index
    %c0_53 = arith.constant 0 : index
    %94 = vector.load %arg4[%c0_52, %c0_53] : memref<128x128xf32, #tpu.memory_space<vmem>>, vector<128x128xf32>
    %cst_54 = arith.constant dense<0.000000e+00> : vector<64x128xf32>
    %95 = tpu.matmul %93, %94, %cst_54 {dimension_numbers = #tpu.dot_dimension_numbers<[1], [0], [0], [1], [0, 0, 1, 1], [], []>} : vector<64x128xf32>, vector<128x128xf32>, vector<64x128xf32> -> vector<64x128xf32>
    %c0_55 = arith.constant 0 : index
    %c0_56 = arith.constant 0 : index
    %96 = vector.load %arg5[%c0_55, %c0_56] : memref<1x128xf32, #tpu.memory_space<vmem>>, vector<1x128xf32>
    %97 = vector.broadcast %96 : vector<1x128xf32> to vector<64x128xf32>
    %98 = arith.addf %95, %97 : vector<64x128xf32>
    %c0_57 = arith.constant 0 : index
    %c0_58 = arith.constant 0 : index
    %c0_59 = arith.constant 0 : index
    %99 = vector.load %arg6[%c0_57, %c0_58, %c0_59] : memref<1x64x128xf32, #tpu.memory_space<vmem>>, vector<1x64x128xf32>
    %100 = vector.shape_cast %99 : vector<1x64x128xf32> to vector<64x128xf32>
    %101 = vector.shape_cast %98 : vector<64x128xf32> to vector<1x64x128xf32>
    tpu.vector_store %arg6[%c0_57, %c0_58, %c0_59], %101 {strides = array<i32>} : memref<1x64x128xf32, #tpu.memory_space<vmem>>, vector<1x64x128xf32>,
    return
  }
  func.func @transform_0(%arg0: i32, %arg1: i32) -> (i32, i32, i32, i32, i32) {
    %c0_i32 = arith.constant 0 : i32
    %c0_i32_0 = arith.constant 0 : i32
    %c0_i32_1 = arith.constant 0 : i32
    %c0_i32_2 = arith.constant 0 : i32
    %c0_i32_3 = arith.constant 0 : i32
    return %arg0, %c0_i32, %c0_i32_0, %c0_i32_1, %c0_i32_2 : i32, i32, i32, i32, i32
  }
  func.func @transform_1(%arg0: i32, %arg1: i32) -> (i32, i32) {
    %c0_i32 = arith.constant 0 : i32
    %c0_i32_0 = arith.constant 0 : i32
    %c0_i32_1 = arith.constant 0 : i32
    return %c0_i32, %c0_i32_0 : i32, i32
  }
  func.func @transform_2(%arg0: i32, %arg1: i32) -> (i32, i32) {
    %c0_i32 = arith.constant 0 : i32
    %c0_i32_0 = arith.constant 0 : i32
    %c0_i32_1 = arith.constant 0 : i32
    return %c0_i32, %c0_i32_0 : i32, i32
  }
  func.func @transform_3(%arg0: i32, %arg1: i32) -> (i32, i32) {
    %c0_i32 = arith.constant 0 : i32
    %c0_i32_0 = arith.constant 0 : i32
    %c0_i32_1 = arith.constant 0 : i32
    return %c0_i32, %c0_i32_0 : i32, i32
  }
  func.func @transform_4(%arg0: i32, %arg1: i32) -> (i32, i32, i32) {
    %c0_i32 = arith.constant 0 : i32
    %c0_i32_0 = arith.constant 0 : i32
    return %arg0, %arg1, %c0_i32 : i32, i32, i32
  }
}

</mosaic_0001>

<bundles_post_ra>
// kernel: tpu_custom_call.1
= control target key start
LH: loop header
LB: loop body
LE: loop exit
PB: predicated region body
PF: predicated region fallthrough
CT: control target
= control target key end

     0   :  { %9 = vsyncpa [#allocation3], 0  ;;  %s1433_s0 = inlined_call_operand.vmem [shape: f32[2,4,9,9,128], index: 0, kind: input, shape index: {}]   ;;  %s1434_s1 = inlined_call_operand.vmem [shape: f32[9,128], index: 1, kind: input, shape index: {}]   ;;  %s1435_s2 = inlined_call_operand.vmem [shape: f32[128,128], index: 2, kind: input, shape index: {}]   ;;  %s1436_s3 = inlined_call_operand.vmem [shape: f32[1,128], index: 3, kind: input, shape index: {}]   ;;  %s1437_s4 = inlined_call_operand.hbm [shape: f32[2,64,128], index: 4, kind: output, shape index: {}]  }
   0x1   :  { %11 = vsyncpa [#allocation3 + $0x1], 0  ;;  %s1073_s15 = smov 0   ;;  %s1075_s16 = smov 0  }
   0x2   :  { %s1077_s17 = smov 0   ;;  %s1079_s18 = smov 0  }
   0x3   :  { %s1081_s19 = smov 0   ;;  %s1083_s20 = smov 0  }
   0x4 LB: > { %s730_s21 = sadd.s32 4294967295, %s1043_s20   ;;  %s731_s22 = sadd.s32 4294967294, %s1043_s20   ;;  %s1043_s20 = sphi %s1083_s20, %s17_s20   ;;  %s1039_s19 = sphi %s1081_s19, %s1444_s19   ;;  %s1035_s18 = sphi %s1079_s18, %s1443_s18   ;;  %s1031_s17 = sphi %s1077_s17, %s1442_s17   ;;  %s1027_s16 = sphi %s1075_s16, %s1441_s16   ;;  %s1023_s15 = sphi %s1073_s15, %s1440_s15  }
   0x5   : > { %s29_s23 = sadd.s32 1, %s1039_s19  ;;  %s127_s24 = sadd.s32 1, %s1031_s17 }
   0x6   : > { %p31_p0 = scmp.ge.s32.totalorder %s29_s23, 2  ;;  %p137_p1 = scmp.ne.s32.totalorder %s1031_s17, %s1027_s16 }
   0x7   : > { %p138_p2 = scmp.eq.s32.totalorder %s730_s21, 1  ;;  %p143_p3 = scmp.ne.s32.totalorder %s1027_s16, %s1023_s15 }
   0x8   : > { %s1446_s23 = smov (%p31_p0, %s29_s23), 0  ;;  %p144_p5 = scmp.eq.s32.totalorder %s731_s22, 1 }
   0x9   : > { %p1113_p4 = por %p138_p2, %p137_p1  ;;  %s122_s26 = ssub.s32 %s1039_s19, %s1446_s23 }
   0xa   : > { %p734_p6 = scmp.ge.s32.totalorder %s1043_s20, 1  ;;  %p125_p7 = scmp.eq.s32.totalorder %s122_s26, 0 }
   0xb   : > { %p1120_p8 = por %p144_p5, %p143_p3  ;;  %p179_p9 = scmp.lt.s32.totalorder %s1043_s20, 3 }
   0xc   : > { %s1126_s28 = scalar_select %p125_p7, %s1031_s17, %s127_s24  }
   0xd   : > { %p180_p10 = pnand %p734_p6, %p179_p9 }
   0xe   : > { %p205_p11 = scmp.lt.s32.totalorder (!%p180_p10), %s1035_s18, 1  ;;  %s202_s13 = sand.u32 (!%p180_p10), 1, %s1027_s16  }
   0xf   : > { %183 = sbr.rel (%p180_p10) target bundleno = 287 (0x11f), region = 36  ;;  %s735_s14 = sshll.u32 (!%p180_p10), %s202_s13, 6 }
  0x10   : > { %s808_s22 = sshll.u32 (!%p180_p10), %s1035_s18, 10  ;;  %s1045_s6 = smov (!%p180_p10), [#allocation2]  }
  0x11   : > { %s1382_s30 = scalar_lea.hbm (!%p180_p10), %s1437_s4, %s808_s22  ;;  %s971_s8 = sshll.u32 (!%p180_p10), %s1045_s6, 4  ;;  %s972_s8 = int_to_ptr.vmem [resolvable:$false] %s971_s8 }
  0x14   : > { %v501_v0 = vld [vmem:[%s1435_s2 + $0x78] sm:$0xff]  ;;  %v500_v1 = vld [vmem:[%s1435_s2 + $0x70] sm:$0xff]  ;;  %v499_v2 = vld [vmem:[%s1435_s2 + $0x68] sm:$0xff]  ;;  %s206_s9 = scalar_select %p205_p11, %s1035_s18, 1 }
  0x15   : > { %833 = vmatprep.subr.mxu0 %v501_v0  ;;  %877 = vmatprep.subr.mxu1 %v501_v0  ;;  %v498_v3 = vld [vmem:[%s1435_s2 + $0x60] sm:$0xff]  ;;  %v497_v4 = vld [vmem:[%s1435_s2 + $0x58] sm:$0xff]  ;;  %v496_v7 = vld [vmem:[%s1435_s2 + $0x50] sm:$0xff]  ;;  %s1388_s18 = scalar_lea.sflag [#allocation3], %s202_s13 }
  0x16   : > { %834 = vmatpush3.msra.mxu0 %v501_v0  ;;  %893 = vmatpush3.msra.mxu1 %v501_v0  ;;  %s909_s12 = smul.u32 576, %s206_s9  ;;  %v1148_v5 = vld [vmem:[%s1434_s1] ss:$0 sm:$0xff]  ;;  %v1153_v6 = vld [vmem:[%s1434_s1 + $0x1] ss:$0 sm:$0xff]  ;;  %v495_v14 = vld [vmem:[%s1435_s2 + $0x48] sm:$0xff] }
  0x17   : > { %835 = vmatprep.subr.mxu0 %v500_v1  ;;  %878 = vmatprep.subr.mxu1 %v500_v1  ;;  %v1166_v8 = vld [vmem:[%s1434_s1 + $0x2] ss:$0 sm:$0xff]  ;;  %v1171_v9 = vld [vmem:[%s1434_s1 + $0x3] ss:$0 sm:$0xff]  ;;  %v1176_v10 = vld [vmem:[%s1434_s1 + $0x4] ss:$0 sm:$0xff] }
  0x18   : > { %836 = vmatpush3.msra.mxu0 %v500_v1  ;;  %894 = vmatpush3.msra.mxu1 %v500_v1  ;;  %s1161_s7 = scalar_lea.vmem %s1433_s0, %s909_s12  ;;  %v1193_v21 = vld [vmem:[%s1434_s1 + $0x5] ss:$0 sm:$0xff]  ;;  %v1199_v23 = vld [vmem:[%s1434_s1 + $0x6] ss:$0 sm:$0xff]  ;;  %v1210_v29 = vld [vmem:[%s1434_s1 + $0x7] ss:$0 sm:$0xff] }
  0x19   : > { %837 = vmatprep.subr.mxu0 %v499_v2  ;;  %879 = vmatprep.subr.mxu1 %v499_v2  ;;  %v214_v11 = vld [vmem:[%s1161_s7] sm:$0xff]  ;;  %v738_v12 = vld [vmem:[%s1161_s7 + $0x90] sm:$0xff]  ;;  %v1219_v32 = vld [vmem:[%s1434_s1 + $0x8] ss:$0 sm:$0xff]  ;;  %s973_s9 = scalar_lea.vmem %s972_s8, 2048 }
  0x1a   : > { %838 = vmatpush3.msra.mxu0 %v499_v2  ;;  %895 = vmatpush3.msra.mxu1 %v499_v2  ;;  %v274_v13 = vld [vmem:[%s1161_s7 + $0x1] sm:$0xff]  ;;  %v227_v15 = vmul.f32 %v1148_v5, %v214_v11  ;;  %v258_v16 = vmul.f32 %v1153_v6, %v738_v12  ;;  %v757_v19 = vld [vmem:[%s1161_s7 + $0x1b0] sm:$0xff]  ;;  %v493_v47 = vld [vmem:[%s1435_s2 + $0x38] sm:$0xff] }
  0x1b   : > { %839 = vmatprep.subr.mxu0 %v498_v3  ;;  %880 = vmatprep.subr.mxu1 %v498_v3  ;;  %v287_v17 = vmul.f32 %v1166_v8, %v274_v13  ;;  %v748_v18 = vld [vmem:[%s1161_s7 + $0x120] sm:$0xff]  ;;  %v775_v22 = vld [vmem:[%s1161_s7 + $0x10] sm:$0xff]  ;;  %v349_v27 = vmul.f32 %v1176_v10, %v757_v19 }
  0x1c   : > { %840 = vmatpush3.msra.mxu0 %v498_v3  ;;  %896 = vmatpush3.msra.mxu1 %v498_v3  ;;  %v766_v20 = vld [vmem:[%s1161_s7 + $0x121] sm:$0xff]  ;;  %v266_v25 = vadd.f32 %v258_v16, %v227_v15  ;;  %v318_v26 = vmul.f32 %v1171_v9, %v748_v18  ;;  %v1214_v31 = vmul.f32 %v1199_v23, %v775_v22  ;;  %v1225_v34 = vld [vmem:[%s1161_s7 + $0xd0] sm:$0xff] }
  0x1d   : > { %841 = vmatprep.subr.mxu0 %v497_v4  ;;  %881 = vmatprep.subr.mxu1 %v497_v4  ;;  %v494_v24 = vld [vmem:[%s1435_s2 + $0x40] sm:$0xff]  ;;  %v378_v30 = vmul.f32 %v1193_v21, %v766_v20  ;;  %v228_v35 = vmul.f32 %v775_v22, %v1148_v5  ;;  %v761_v40 = vld [vmem:[%s1161_s7 + $0x1f0] sm:$0xff]  ;;  %v262_v44 = vmul.f32 %v1153_v6, %v1225_v34  ;;  %v491_v3 = vld [vmem:[%s1435_s2 + $0x28] sm:$0xff] }
  0x1e   : > { %842 = vmatpush3.msra.mxu0 %v497_v4  ;;  %897 = vmatpush3.msra.mxu1 %v497_v4  ;;  %v784_v28 = vld [vmem:[%s1161_s7 + $0xa0] sm:$0xff]  ;;  %v295_v36 = vadd.f32 %v287_v17, %v266_v25  ;;  %v793_v43 = vld [vmem:[%s1161_s7 + $0x11] sm:$0xff]  ;;  %v353_v53 = vmul.f32 %v1176_v10, %v761_v40 }
  0x1f   : > { %843 = vmatprep.subr.mxu0 %v496_v7  ;;  %882 = vmatprep.subr.mxu1 %v496_v7  ;;  %v1222_v33 = vld [vmem:[%s1161_s7 + $0x40] sm:$0xff]  ;;  %v259_v41 = vmul.f32 %v784_v28, %v1153_v6  ;;  %v441_v42 = vmul.f32 %v1210_v29, %v784_v28  ;;  %v1247_v49 = vmul.f32 %v1219_v32, %v793_v43  ;;  %v749_v51 = vld [vmem:[%s1161_s7 + $0x130] sm:$0xff] }
  0x20   : > { %844 = vmatpush3.msra.mxu0 %v496_v7  ;;  %898 = vmatpush3.msra.mxu1 %v496_v7  ;;  %v231_v37 = vmul.f32 %v1148_v5, %v1222_v33  ;;  %v1231_v38 = vld [vmem:[%s1161_s7 + $0x41] sm:$0xff]  ;;  %v326_v48 = vadd.f32 %v318_v26, %v295_v36  ;;  %v779_v55 = vld [vmem:[%s1161_s7 + $0x50] sm:$0xff]  ;;  %v288_v0 = vmul.f32 %v793_v43, %v1166_v8  ;;  %v489_v26 = vld [vmem:[%s1435_s2 + $0x18] sm:$0xff] }
  0x21   : > { %v752_v39 = vld [vmem:[%s1161_s7 + $0x160] sm:$0xff]  ;;  %845 = vmatprep.subr.mxu0 %v495_v14  ;;  %883 = vmatprep.subr.mxu1 %v495_v14  ;;  %v291_v45 = vmul.f32 %v1166_v8, %v1231_v38  ;;  %v492_v56 = vld [vmem:[%s1435_s2 + $0x30] sm:$0xff]  ;;  %v414_v58 = vmul.f32 %v1199_v23, %v779_v55  ;;  %v267_v59 = vadd.f32 %v259_v41, %v228_v35 }
  0x22   : > { %v770_v46 = vld [vmem:[%s1161_s7 + $0x161] sm:$0xff]  ;;  %846 = vmatpush3.msra.mxu0 %v495_v14  ;;  %899 = vmatpush3.msra.mxu1 %v495_v14  ;;  %v322_v50 = vmul.f32 %v1171_v9, %v752_v39  ;;  %v270_v52 = vadd.f32 %v262_v44, %v231_v37  ;;  %v357_v57 = vadd.f32 %v349_v27, %v326_v48  ;;  %v797_v63 = vld [vmem:[%s1161_s7 + $0x51] sm:$0xff] }
  0x23   : > { %847 = vmatprep.subr.mxu0 %v494_v24  ;;  %884 = vmatprep.subr.mxu1 %v494_v24  ;;  %v382_v54 = vmul.f32 %v1193_v21, %v770_v46  ;;  %v758_v60 = vld [vmem:[%s1161_s7 + $0x1c0] sm:$0xff]  ;;  %v319_v1 = vmul.f32 %v1171_v9, %v749_v51  ;;  %v767_v2 = vld [vmem:[%s1161_s7 + $0x131] sm:$0xff]  ;;  %v1269_v11 = vmul.f32 %v1219_v32, %v797_v63 }
  0x24   : > { %848 = vmatpush3.msra.mxu0 %v494_v24  ;;  %900 = vmatpush3.msra.mxu1 %v494_v24  ;;  %v299_v61 = vadd.f32 %v291_v45, %v270_v52  ;;  %v788_v62 = vld [vmem:[%s1161_s7 + $0xe0] sm:$0xff]  ;;  %v386_v4 = vadd.f32 %v378_v30, %v357_v57  ;;  %v296_v13 = vadd.f32 %v288_v0, %v267_v59  ;;  %v753_v25 = vld [vmem:[%s1161_s7 + $0x170] sm:$0xff] }
  0x25   : > { %849 = vmatprep.subr.mxu0 %v493_v47  ;;  %885 = vmatprep.subr.mxu1 %v493_v47  ;;  %v445_v7 = vmul.f32 %v1210_v29, %v788_v62  ;;  %v350_v14 = vmul.f32 %v1176_v10, %v758_v60  ;;  %v776_v15 = vld [vmem:[%s1161_s7 + $0x20] sm:$0xff]  ;;  %v379_v18 = vmul.f32 %v1193_v21, %v767_v2  ;;  %v785_v28 = vld [vmem:[%s1161_s7 + $0xb0] sm:$0xff] }
  0x26   : > { %850 = vmatpush3.msra.mxu0 %v493_v47  ;;  %901 = vmatpush3.msra.mxu1 %v493_v47  ;;  %v330_v12 = vadd.f32 %v322_v50, %v299_v61  ;;  %v490_v16 = vld [vmem:[%s1435_s2 + $0x20] sm:$0xff]  ;;  %v418_v17 = vadd.f32 %v1214_v31, %v386_v4  ;;  %v411_v19 = vmul.f32 %v1199_v23, %v776_v15  ;;  %v771_v41 = vld [vmem:[%s1161_s7 + $0x171] sm:$0xff]  ;;  %v487_v50 = vld [vmem:[%s1435_s2 + $0x8] sm:$0xff] }
  0x27   : > { %851 = vmatprep.subr.mxu0 %v492_v56  ;;  %886 = vmatprep.subr.mxu1 %v492_v56  ;;  %v327_v22 = vadd.f32 %v319_v1, %v296_v13  ;;  %v232_v24 = vmul.f32 %v779_v55, %v1148_v5  ;;  %v263_v30 = vmul.f32 %v788_v62, %v1153_v6  ;;  %v794_v39 = vld [vmem:[%s1161_s7 + $0x21] sm:$0xff]  ;;  %v759_v1 = vld [vmem:[%s1161_s7 + $0x1d0] sm:$0xff] }
  0x28   : > { %852 = vmatpush3.msra.mxu0 %v492_v56  ;;  %902 = vmatpush3.msra.mxu1 %v492_v56  ;;  %v361_v20 = vadd.f32 %v353_v53, %v330_v12  ;;  %v449_v27 = vadd.f32 %v441_v42, %v418_v17  ;;  %v292_v31 = vmul.f32 %v797_v63, %v1166_v8  ;;  %v762_v40 = vld [vmem:[%s1161_s7 + $0x200] sm:$0xff]  ;;  %v488_v42 = vld [vmem:[%s1435_s2 + $0x10] sm:$0xff] }
  0x29   : > { %853 = vmatprep.subr.mxu0 %v491_v3  ;;  %887 = vmatprep.subr.mxu1 %v491_v3  ;;  %v358_v36 = vadd.f32 %v350_v14, %v327_v22  ;;  %v442_v37 = vmul.f32 %v1210_v29, %v785_v28  ;;  %v471_v43 = vmul.f32 %v1219_v32, %v794_v39  ;;  %v750_v57 = vld [vmem:[%s1161_s7 + $0x140] sm:$0xff] }
  0x2a   : > { %854 = vmatpush3.msra.mxu0 %v491_v3  ;;  %903 = vmatpush3.msra.mxu1 %v491_v3  ;;  %v390_v35 = vadd.f32 %v382_v54, %v361_v20  ;;  %v271_v44 = vadd.f32 %v263_v30, %v232_v24  ;;  %v323_v45 = vmul.f32 %v1171_v9, %v753_v25  ;;  %v780_v54 = vld [vmem:[%s1161_s7 + $0x60] sm:$0xff]  ;;  %v789_v3 = vld [vmem:[%s1161_s7 + $0xf0] sm:$0xff] }
  0x2b   : > { %855 = vmatprep.subr.mxu0 %v490_v16  ;;  %888 = vmatprep.subr.mxu1 %v490_v16  ;;  %v478_v46 = vadd.f32 %v1247_v49, %v449_v27  ;;  %v387_v48 = vadd.f32 %v379_v18, %v358_v36  ;;  %v354_v52 = vmul.f32 %v1176_v10, %v762_v40  ;;  %v768_v12 = vld [vmem:[%s1161_s7 + $0x141] sm:$0xff]  ;;  %v763_v36 = vld [vmem:[%s1161_s7 + $0x210] sm:$0xff] }
  0x2c   : > { %856 = vmatpush3.msra.mxu0 %v490_v16  ;;  %904 = vmatpush3.msra.mxu1 %v490_v16  ;;  %v422_v47 = vadd.f32 %v414_v58, %v390_v35  ;;  %v300_v51 = vadd.f32 %v292_v31, %v271_v44  ;;  %v383_v53 = vmul.f32 %v1193_v21, %v771_v41  ;;  %v486_v58 = vld [vmem:[%s1435_s2] sm:$0xff] }
  0x2d   : > { %857 = vmatprep.subr.mxu0 %v489_v26  ;;  %889 = vmatprep.subr.mxu1 %v489_v26  ;;  %v419_v56 = vadd.f32 %v411_v19, %v387_v48  ;;  %v415_v49 = vmul.f32 %v1199_v23, %v780_v54  ;;  %v229_v60 = vmul.f32 %v776_v15, %v1148_v5  ;;  %v754_v22 = vld [vmem:[%s1161_s7 + $0x180] sm:$0xff] }
  0x2e   : > { %858 = vmatpush3.msra.mxu0 %v489_v26  ;;  %905 = vmatpush3.msra.mxu1 %v489_v26  ;;  %v453_v55 = vadd.f32 %v445_v7, %v422_v47  ;;  %v331_v59 = vadd.f32 %v323_v45, %v300_v51  ;;  %v260_v61 = vmul.f32 %v785_v28, %v1153_v6  ;;  %v777_v26 = vld [vmem:[%s1161_s7 + $0x30] sm:$0xff]  ;;  %v786_v27 = vld [vmem:[%s1161_s7 + $0xc0] sm:$0xff] }
  0x2f   : > { %859 = vmatprep.subr.mxu0 %v488_v42  ;;  %890 = vmatprep.subr.mxu1 %v488_v42  ;;  %v450_v63 = vadd.f32 %v442_v37, %v419_v56  ;;  %v289_v0 = vmul.f32 %v794_v39, %v1166_v8  ;;  %v320_v7 = vmul.f32 %v1171_v9, %v750_v57  ;;  %v795_v28 = vld [vmem:[%s1161_s7 + $0x31] sm:$0xff]  ;;  %v772_v44 = vld [vmem:[%s1161_s7 + $0x181] sm:$0xff] }
  0x30   : > { %860 = vmatpush3.msra.mxu0 %v488_v42  ;;  %906 = vmatpush3.msra.mxu1 %v488_v42  ;;  %v482_v62 = vadd.f32 %v1269_v11, %v453_v55  ;;  %v362_v2 = vadd.f32 %v354_v52, %v331_v59  ;;  %v268_v4 = vadd.f32 %v260_v61, %v229_v60  ;;  %v798_v11 = vld [vmem:[%s1161_s7 + $0x61] sm:$0xff]  ;;  %v751_v42 = vld [vmem:[%s1161_s7 + $0x150] sm:$0xff] }
  0x31   : > { %861 = vmatprep.subr.mxu0 %v487_v50  ;;  %891 = vmatprep.subr.mxu1 %v487_v50  ;;  %v479_v13 = vadd.f32 %v471_v43, %v450_v63  ;;  %v446_v14 = vmul.f32 %v1210_v29, %v789_v3  ;;  %v351_v17 = vmul.f32 %v1176_v10, %v759_v1  ;;  %v760_v48 = vld [vmem:[%s1161_s7 + $0x1e0] sm:$0xff]  ;;  %v799_v56 = vld [vmem:[%s1161_s7 + $0x71] sm:$0xff] }
  0x32   : > { %862 = vmatpush3.msra.mxu0 %v487_v50  ;;  %907 = vmatpush3.msra.mxu1 %v487_v50  ;;  %v391_v15 = vadd.f32 %v383_v53, %v362_v2  ;;  %v297_v16 = vadd.f32 %v289_v0, %v268_v4  ;;  %v475_v18 = vmul.f32 %v1219_v32, %v798_v11  ;;  %v790_v55 = vld [vmem:[%s1161_s7 + $0x100] sm:$0xff]  ;;  %v769_v63 = vld [vmem:[%s1161_s7 + $0x151] sm:$0xff] }
  0x33   : > { %863 = vmatprep.subr.mxu0 %v486_v58  ;;  %892 = vmatprep.subr.mxu1 %v486_v58  ;;  %v380_v19 = vmul.f32 %v1193_v21, %v768_v12  ;;  %v233_v20 = vmul.f32 %v780_v54, %v1148_v5  ;;  %v264_v30 = vmul.f32 %v789_v3, %v1153_v6  ;;  %v781_v54 = vld [vmem:[%s1161_s7 + $0x70] sm:$0xff] }
  0x34   : > { %864 = vmatpush3.msra.mxu0 %v486_v58  ;;  %908 = vmatpush3.msra.mxu1 %v486_v58  ;;  %v423_v24 = vadd.f32 %v415_v49, %v391_v15  ;;  %v328_v25 = vadd.f32 %v320_v7, %v297_v16  ;;  %v293_v31 = vmul.f32 %v798_v11, %v1166_v8  ;;  %v755_v0 = vld [vmem:[%s1161_s7 + $0x190] sm:$0xff] }
  0x35   : > { %865 = vmatprep.mubr.f32.mxu0 %v478_v46  ;;  %871 = vmatprep.mubr.f32.mxu1 %v482_v62  ;;  %v412_v35 = vmul.f32 %v1199_v23, %v777_v26  ;;  %v272_v40 = vadd.f32 %v264_v30, %v233_v20  ;;  %v324_v41 = vmul.f32 %v1171_v9, %v754_v22 }
  0x36   : > { %866 = vmatmul.mubr.f32.vlgmr.msra.gmra.mxu0 %v479_v13  ;;  %v454_v37 = vadd.f32 %v446_v14, %v423_v24  ;;  %v359_v39 = vadd.f32 %v351_v17, %v328_v25  ;;  %v443_v43 = vmul.f32 %v1210_v29, %v786_v27  ;;  %v230_v45 = vmul.f32 %v777_v26, %v1148_v5  ;;  %v764_v14 = vld [vmem:[%s1161_s7 + $0x220] sm:$0xff] }
  0x37   : > { %v261_v46 = vmul.f32 %v786_v27, %v1153_v6  ;;  %v290_v47 = vmul.f32 %v795_v28, %v1166_v8  ;;  %v301_v52 = vadd.f32 %v293_v31, %v272_v40  ;;  %v355_v53 = vmul.f32 %v1176_v10, %v763_v36  ;;  %v782_v27 = vld [vmem:[%s1161_s7 + $0x80] sm:$0xff]  ;;  %v791_v36 = vld [vmem:[%s1161_s7 + $0x110] sm:$0xff] }
  0x38   : > { %v483_v50 = vadd.f32 %v475_v18, %v454_v37  ;;  %v388_v51 = vadd.f32 %v380_v19, %v359_v39  ;;  %v472_v49 = vmul.f32 %v1219_v32, %v795_v28  ;;  %v321_v58 = vmul.f32 %v1171_v9, %v751_v42 }
  0x39   : > { %v269_v57 = vadd.f32 %v261_v46, %v230_v45  ;;  %v332_v60 = vadd.f32 %v324_v41, %v301_v52  ;;  %v384_v61 = vmul.f32 %v1193_v21, %v772_v44  ;;  %v352_v62 = vmul.f32 %v1176_v10, %v760_v48  ;;  %v800_v41 = vld [vmem:[%s1161_s7 + $0x81] sm:$0xff] }
  0x3a   : > { %872 = vmatmul.mubr.f32.vlgmr.msra.gmra.mxu1 %v483_v50  ;;  %v420_v59 = vadd.f32 %v412_v35, %v388_v51  ;;  %v234_v2 = vmul.f32 %v781_v54, %v1148_v5  ;;  %v265_v3 = vmul.f32 %v790_v55, %v1153_v6  ;;  %v294_v4 = vmul.f32 %v799_v56, %v1166_v8  ;;  %v773_v6 = vld [vmem:[%s1161_s7 + $0x191] sm:$0xff]  ;;  %s204_s7 = scalar_lea.vmem [#allocation2], %s735_s14 }
  0x3b   : > { %v298_v1 = vadd.f32 %v290_v47, %v269_v57  ;;  %v363_v12 = vadd.f32 %v355_v53, %v332_v60  ;;  %v416_v13 = vmul.f32 %v1199_v23, %v781_v54  ;;  %v381_v15 = vmul.f32 %v1193_v21, %v769_v63  ;;  %s638_s24 = sshll.u32 %s204_s7, 4  ;;  %s1384_s24 = int_to_ptr.vmem [resolvable:$true] %s638_s24 }
  0x3c   : > { %v451_v7 = vadd.f32 %v443_v43, %v420_v59  ;;  %v273_v16 = vadd.f32 %v265_v3, %v234_v2  ;;  %v325_v17 = vmul.f32 %v1171_v9, %v755_v0  ;;  %v447_v5 = vmul.f32 %v1210_v29, %v790_v55  ;;  %s967_s5 = scalar_lea.vmem %s1384_s24, 1024  ;;  %p974_p1 = scmp.lt.s32.totalorder %s1384_s24, %s972_s8 }
  0x3d   : > { %v329_v11 = vadd.f32 %v321_v58, %v298_v1  ;;  %v392_v19 = vadd.f32 %v384_v61, %v363_v12  ;;  %v413_v8 = vmul.f32 %v1199_v23, %v1222_v33  ;;  %v356_v24 = vmul.f32 %v1176_v10, %v764_v14  ;;  %p968_p12 = scmp.ne.s32.totalorder %s1384_s24, %s967_s5  ;;  %p975_p2 = scmp.lt.s32.totalorder %s973_s9, %s967_s5 }
  0x3e   : > { %v480_v18 = vadd.f32 %v472_v49, %v451_v7  ;;  %v302_v22 = vadd.f32 %v294_v4, %v273_v16  ;;  %v476_v26 = vmul.f32 %v1219_v32, %v799_v56  ;;  %v444_v28 = vmul.f32 %v1210_v29, %v1225_v34 }
  0x3f   : > { %v360_v20 = vadd.f32 %v352_v62, %v329_v11  ;;  %v424_v25 = vadd.f32 %v416_v13, %v392_v19  ;;  %v385_v31 = vmul.f32 %v1193_v21, %v773_v6  ;;  %v473_v33 = vmul.f32 %v1219_v32, %v1231_v38  ;;  %p969_p13 = pnand %p968_p12, %p1113_p4  ;;  %p976_p3 = por %p975_p2, %p974_p1 }
  0x40   : > { %868 = vmatprep.mubr.f32.mxu0 %v480_v18  ;;  %v333_v30 = vadd.f32 %v325_v17, %v302_v22  ;;  %v417_v39 = vmul.f32 %v1199_v23, %v782_v27  ;;  %v448_v34 = vmul.f32 %v1210_v29, %v791_v36  ;;  %v477_v45 = vmul.f32 %v1219_v32, %v800_v41  ;;  %v802_v23 = vld [vmem:[%s1436_s3] ss:$0 sm:$0xff] }
  0x41   : > { %v389_v9 = vadd.f32 %v381_v15, %v360_v20  ;;  %v455_v35 = vadd.f32 %v447_v5, %v424_v25  ;;  %p970_p0 = pneg %p969_p13 }
  0x42   : > { %v364_v10 = vadd.f32 %v356_v24, %v333_v30 }
  0x43   : > { %v421_v37 = vadd.f32 %v413_v8, %v389_v9  ;;  %v484_v40 = vadd.f32 %v476_v26, %v455_v35  ;;  %p977_p5 = pnand %p976_p3, %p970_p0 }
  0x44   : > { %v393_v43 = vadd.f32 %v385_v31, %v364_v10 }
  0x45   : > { %v452_v42 = vadd.f32 %v444_v28, %v421_v37  ;;  %874 = vmatprep.mubr.f32.mxu1 %v484_v40 }
  0x46   : > { %v425_v21 = vadd.f32 %v417_v39, %v393_v43 }
  0x47   : > { %v481_v44 = vadd.f32 %v473_v33, %v452_v42 }
  0x48   : > { %v456_v46 = vadd.f32 %v448_v34, %v425_v21 }
  0x49   : > { %869 = vmatmul.mubr.f32.gmra.mxu0 %v481_v44 }
  0x4a   : > { %v485_v47 = vadd.f32 %v477_v45, %v456_v46 }
  0x4c   : > { %875 = vmatmul.mubr.f32.gmra.mxu1 %v485_v47 }
  0xf6   : > { %v867_v38 = vpop.f32.mrf.mxu0 }
  0xf7   : > { %v581_v48 = vadd.f32 %v867_v38, %v802_v23 }
  0xf8   : > { %v575_v50 = vpop.f32.mrf.mxu0 }
  0xf9   : > { %615 = vst [vmem:[%s204_s7 + $0x8] sm:$0xff] %v581_v48  ;;  %v576_v29 = vadd.f32 %v802_v23, %v575_v50 }
  0xfa   : > { %v873_v32 = vpop.f32.mrf.mxu1 }
  0xfb   : > { %614 = vst [vmem:[%s204_s7] sm:$0xff] %v576_v29  ;;  %v601_v51 = vadd.f32 %v873_v32, %v802_v23 }
  0xfc   : > { %v595_v52 = vpop.f32.mrf.mxu1 }
  0xfd   : > { %619 = vst [vmem:[%s204_s7 + $0x28] sm:$0xff] %v601_v51  ;;  %v596_v53 = vadd.f32 %v802_v23, %v595_v52 }
  0xff   : > { %618 = vst [vmem:[%s204_s7 + $0x20] sm:$0xff] %v596_v53 }
 0x109   : > { %v870_v54 = vpop.f32.mrf.mxu0 }
 0x10a   : > { %v591_v55 = vadd.f32 %v870_v54, %v802_v23 }
 0x10b   : > { %v585_v56 = vpop.f32.mrf.mxu0 }
 0x10c   : > { %617 = vst [vmem:[%s204_s7 + $0x18] sm:$0xff] %v591_v55  ;;  %v586_v49 = vadd.f32 %v802_v23, %v585_v56  ;;  %v876_v57 = vpop.f32.mrf.mxu1 }
 0x10d   : > { %v611_v58 = vadd.f32 %v876_v57, %v802_v23 }
 0x10e   : > { %616 = vst [vmem:[%s204_s7 + $0x10] sm:$0xff] %v586_v49  ;;  %v605_v59 = vpop.f32.mrf.mxu1 }
 0x10f   : > { %621 = vst [vmem:[%s204_s7 + $0x38] sm:$0xff] %v611_v58  ;;  %v606_v60 = vadd.f32 %v802_v23, %v605_v59 }
 0x111   : > { %620 = vst [vmem:[%s204_s7 + $0x30] sm:$0xff] %v606_v60 }
 0x112   : > { %980 = shalt.err (!%p977_p5)
}
 0x113   : > { %s981_s10 = scalar_lea.hbm %s1382_s30, 1024  ;;  %s985_s14 = scalar_lea.hbm %s1437_s4, 2048 }
 0x114   : > { %p982_p6 = scmp.ne.s32.totalorder %s1382_s30, %s981_s10  ;;  %p986_p10 = scmp.lt.s32.totalorder %s1382_s30, %s1437_s4 }
 0x115   : > { %p987_p11 = scmp.lt.s32.totalorder %s985_s14, %s981_s10 }
 0x116   : > { %p983_p7 = pnand %p982_p6, %p1113_p4 }
 0x117   : > { %p988_p12 = por %p987_p11, %p986_p10 }
 0x118   : > { %p984_p9 = pneg %p983_p7 }
 0x11a   : > { %p989_p13 = pnand %p988_p12, %p984_p9 }
 0x11c   : > { %992 = shalt.err (!%p989_p13)
}
 0x11d   : > { %s1046_s7 = smov 128   ;;  %s1047_s22 = smov 8  }
 0x11e   : > { %910 = dma.vmem_to_hbm [thread:$0]  (%p1113_p4), %s1384_s24, 1024, %s1382_s30, %s1388_s18, %s1046_s7, %s1046_s7, %s1047_s22  }
 0x11f PF: > { %p916_p0 = scmp.ge.s32.totalorder %s1043_s20, 2  ;;  %s653_s26 = sand.u32 1, %s1023_s15  }
 0x120   : > { %s654_s29 = scalar_lea.sflag [#allocation3], %s653_s26 }
 0x121   : > { %p913_p1 = pnand %p916_p0, %p1120_p8 }
 0x123   : > { %p914_p2 = pneg %p913_p1 }
 0x125   : > { %1018 = dma.done.wait (%p914_p2), %s654_s29, 1024  }
 0x126   : > { %1020 = vsyncadd (%p914_p2), %s654_s29, 4294966272  ;;  %s17_s20 = sadd.s32 1, %s1043_s20   ;;  %s1440_s15 = smov %s1027_s16 }
 0x127   : > { %p14_p3 = scmp.ge.s32.totalorder %s17_s20, 4   ;;  %s1441_s16 = smov %s1031_s17 }
 0x128   : > { %s1442_s17 = smov %s1126_s28  ;;  %s1443_s18 = smov %s1039_s19 }
 0x129   : > { %s1444_s19 = smov %s1446_s23  ;;  %16 = sbr.rel (!%p14_p3) target bundleno = 4 (0x4), region = 77 }
 0x12e   :  { %659 = vsyncpa [#allocation3], 1 }
 0x12f   :  { %661 = vsyncpa [#allocation3 + $0x1], 1 }

</bundles_post_ra>
